<compile_context>
chip_gen: v7x
topology: tpu7x:2x2x1
jax: 0.10.0
libtpu: 0.0.40
codegen_flags: <defaults>
</compile_context>

<pallas_src>
import functools

import jax
import jax.numpy as jnp
from jax.experimental import pallas as pl
from jax.experimental.pallas import tpu as pltpu

# ----------------------------- model config ---------------------------------
INPUT_SIZE = 64      # small, TPU-friendly stand-in for 600
HIDDEN_SIZE = 32     # small, TPU-friendly stand-in for 100
NUM_LAYERS = 2
NUM_CLASSES = 2
BATCH = 8

LANE = 128                    # TPU lane width
HALF = LANE // 2              # 64: i-gates live in lanes [0, HALF), g-gates in [HALF, LANE)
PACKED_GATES = 2 * LANE       # 256 columns per layer matmul: [i|g] block + [o|pad] block
PACKED_H = LANE               # concat(h_fwd, h_bwd) = 2H, padded to 128 lanes


# ----------------------------- fused Pallas kernel ---------------------------
def _fused_birnn_kernel(num_layers, two_h, *refs):
    """Whole forward in one kernel: all LSTM layers (both directions) + fc.

    refs = (x, wg_0, bg_0, ..., wg_{L-1}, bg_{L-1}, fc_w, fc_b, out)
      x    : (B, D_in0)         bf16
      wg_l : (D_in_l, 256)      bf16, pre-transposed, [i_fwd|i_bwd|g_fwd|g_bwd | o_fwd|o_bwd|pad]
      bg_l : (1, 256)           f32, pre-summed b_ih + b_hh, same packing
      fc_w : (128, 128)         bf16, pre-transposed, zero-padded
      fc_b : (1, 128)           f32
      out  : (B, 128)           f32, lane-dense; logits live in lanes [0, num_classes)
    """
    x_ref = refs[0]
    layer_refs = refs[1:1 + 2 * num_layers]
    fc_w_ref, fc_b_ref, o_ref = refs[1 + 2 * num_layers:]

    h = x_ref[...]                                          # bf16 (B, D_in)
    B = h.shape[0]
    # Hoisted once: lane index for the sigmoid/tanh split and the pad mask.
    lane = jax.lax.broadcasted_iota(jnp.int32, (B, LANE), 1)

    for l in range(num_layers):
        wg = layer_refs[2 * l][...]                         # bf16 (D_in, 256)
        bg = layer_refs[2 * l + 1][...]                     # f32  (1, 256)
        # One bf16 MXU matmul covers BOTH directions and all three live gates;
        # accumulate in f32, add the pre-summed bias in f32.
        gates = jnp.dot(h, wg, preferred_element_type=jnp.float32) + bg   # (B, 256) f32
        blk0 = gates[:, 0 * LANE:1 * LANE]   # [i_fwd|i_bwd|g_fwd|g_bwd]
        blk1 = gates[:, 1 * LANE:2 * LANE]   # [o_fwd|o_bwd|pad]
        # sigmoid on the i half, tanh on the g half (single lane select, f32 EUP math).
        ig = jnp.where(lane < HALF, jax.nn.sigmoid(blk0), jnp.tanh(blk0))
        # XLU roll (free slot) aligns g lanes under i lanes -> c = i*g elementwise.
        c = ig * pltpu.roll(ig, shift=HALF, axis=1)          # lanes [0, 2H) hold c
        o_gate = jax.nn.sigmoid(blk1)                        # lanes [0, 2H) hold o
        h_f32 = o_gate * jnp.tanh(c)                         # lanes [0, 2H) = [h_fwd|h_bwd]
        # Zero the padding lanes so the next operand is exact (single VPU select),
        # then drop to bf16 for the next MXU matmul.
        h = jnp.where(lane < two_h, h_f32, 0.0).astype(jnp.bfloat16)      # (B, 128) bf16

    # fc head; output stays lane-dense, sliced to num_classes in the wrapper.
    o_ref[...] = jnp.dot(h, fc_w_ref[...],
                         preferred_element_type=jnp.float32) + fc_b_ref[...]


# ----------------------------- parameter packing -----------------------------
def prepare_packed_params(params, input_size=INPUT_SIZE, hidden_size=HIDDEN_SIZE,
                          num_layers=NUM_LAYERS, num_classes=NUM_CLASSES):
    """One-time prep: transpose weights, concat fwd+bwd, pre-sum biases, pack the
    gates into 2x128 lane blocks, cast matmul operands to bf16.  Removes all
    per-forward XLA transposes, bias adds, casts and concats."""
    H = hidden_size
    # The packing layout silently breaks outside these bounds -> fail loudly.
    assert 2 * H <= HALF, (
        f"gate packing needs 2*hidden ({2 * H}) <= {HALF} lanes per half-block; "
        f"regenerate the layout (wider gate blocks) for larger hidden sizes")
    assert 2 * H <= PACKED_H, f"2*hidden ({2 * H}) must fit in {PACKED_H} lanes"
    assert num_classes <= LANE, f"num_classes ({num_classes}) must fit in {LANE} lanes"

    packed = {}
    # PyTorch gate order inside weight_ih / biases is [i, f, g, o]; f is dropped
    # because it only scales c0 == 0 for seq_len == 1.
    gate_rows = {"i": (0 * H, 1 * H), "g": (2 * H, 3 * H), "o": (3 * H, 4 * H)}
    # Lane offsets of each gate inside the packed 256-column matrix.
    col_base = {"i": 0, "g": HALF, "o": LANE}
    for layer in range(num_layers):
        d_in_raw = input_size if layer == 0 else 2 * H
        d_in = input_size if layer == 0 else PACKED_H
        wg = jnp.zeros((d_in, PACKED_GATES), jnp.float32)
        bg = jnp.zeros((1, PACKED_GATES), jnp.float32)
        for di, suffix in enumerate(("", "_rev")):          # 0: fwd, 1: bwd
            w = params[f"w_ih_l{layer}{suffix}"].astype(jnp.float32)      # (4H, d_in_raw)
            b = (params[f"b_ih_l{layer}{suffix}"]
                 + params[f"b_hh_l{layer}{suffix}"]).astype(jnp.float32)  # (4H,)
            for gate, (s, e) in gate_rows.items():
                c0 = col_base[gate] + di * H
                wg = wg.at[:d_in_raw, c0:c0 + H].set(w[s:e].T)
                bg = bg.at[0, c0:c0 + H].set(b[s:e])
        packed[f"wg{layer}"] = wg.astype(jnp.bfloat16)    # bf16 MXU operand
        packed[f"bg{layer}"] = bg                         # f32, added after the f32 accumulate
        # NOTE: weight_hh_l{k}{suffix} multiplies h0 == 0 for seq_len == 1 -> omitted.
    fc_w = jnp.zeros((PACKED_H, LANE), jnp.float32)
    fc_b = jnp.zeros((1, LANE), jnp.float32)
    fc_w = fc_w.at[:2 * H, :num_classes].set(params["fc_w"].astype(jnp.float32).T)
    fc_b = fc_b.at[0, :num_classes].set(params["fc_b"].astype(jnp.float32))
    packed["fc_w"] = fc_w.astype(jnp.bfloat16)            # bf16 MXU operand
    packed["fc_b"] = fc_b
    return packed


# ----------------------------- forward pass ----------------------------------
@functools.partial(jax.jit,
                   static_argnames=("num_layers", "num_classes", "hidden_size"))
def birnn_forward(packed, x, num_layers=NUM_LAYERS, num_classes=NUM_CLASSES,
                  hidden_size=HIDDEN_SIZE):
    # Guard the seq_len == 1 / zero-initial-state specialization: this wrapper
    # only accepts a single time-step batch of feature vectors, exactly like
    # the reference module's forward (x.unsqueeze(0)).
    assert x.ndim == 2, f"expected (batch, features), got shape {x.shape}"
    B, D0 = x.shape

    inputs = [x.astype(jnp.bfloat16)]                       # bf16 MXU operand
    for layer in range(num_layers):
        inputs += [packed[f"wg{layer}"], packed[f"bg{layer}"]]
    inputs += [packed["fc_w"], packed["fc_b"]]

    # Advisory cost hint so XLA schedules surrounding HLO around this tiny call.
    flops = 2 * B * (D0 * PACKED_GATES
                     + (num_layers - 1) * PACKED_H * PACKED_GATES
                     + PACKED_H * LANE)
    transcendentals = B * num_layers * 4 * LANE             # sigmoid/tanh lanes per layer
    bytes_accessed = (sum(int(a.size) * a.dtype.itemsize for a in inputs)
                      + B * LANE * 4)

    # Whole problem (<100 KB of weights + (B,128) activations) fits trivially in
    # VMEM on v5e/v6e/v7x; no grid / pipelining needed at this size.
    # TODO(synk): if batch is scaled to production sizes (or many calls are
    # stacked into one), add a batch-tiled grid (grid=(cdiv(B, TB),),
    # dimension_semantics=("parallel",), weights with index_map lambda i: (0, 0))
    # so v7x's two TensorCores split the batch; at B=8 a grid is pure overhead.
    out = pl.pallas_call(
        functools.partial(_fused_birnn_kernel, num_layers, 2 * hidden_size),
        out_shape=jax.ShapeDtypeStruct((B, LANE), jnp.float32),
        in_specs=[pl.BlockSpec(memory_space=pltpu.MemorySpace.VMEM)] * len(inputs),
        out_specs=pl.BlockSpec(memory_space=pltpu.MemorySpace.VMEM),
        cost_estimate=pl.CostEstimate(flops=flops,
                                      transcendentals=transcendentals,
                                      bytes_accessed=bytes_accessed),
    )(*inputs)
    return out[:, :num_classes]


# ----------------------------- parameters ------------------------------------
def init_params(key, input_size, hidden_size, num_layers, num_classes):
    """Deterministic init matching PyTorch param shapes (uniform +/- 1/sqrt(H))."""
    params = {}
    bound = 1.0 / jnp.sqrt(jnp.float32(hidden_size))

    def u(k, shape):
        return jax.random.uniform(k, shape, jnp.float32, -bound, bound)

    for layer in range(num_layers):
        d_in = input_size if layer == 0 else 2 * hidden_size
        for suffix in ("", "_rev"):
            key, k1, k2, k3 = jax.random.split(key, 4)
            params[f"w_ih_l{layer}{suffix}"] = u(k1, (4 * hidden_size, d_in))
            params[f"b_ih_l{layer}{suffix}"] = u(k2, (4 * hidden_size,))
            params[f"b_hh_l{layer}{suffix}"] = u(k3, (4 * hidden_size,))
    key, k1, k2 = jax.random.split(key, 3)
    params["fc_w"] = u(k1, (num_classes, 2 * hidden_size))
    params["fc_b"] = u(k2, (num_classes,))
    return params


# ----------------------------- pure-JAX reference ----------------------------
def birnn_reference(params, x, hidden_size=HIDDEN_SIZE, num_layers=NUM_LAYERS):
    """Same math as the module's forward (seq_len==1, zero state), with the same
    mixed precision as the kernel: bf16 matmul operands, f32 accumulation and
    f32 elementwise gate math."""
    H = hidden_size
    inp = x.astype(jnp.bfloat16)
    for layer in range(num_layers):
        outs = []
        for suffix in ("", "_rev"):
            w = params[f"w_ih_l{layer}{suffix}"].astype(jnp.bfloat16)
            b = (params[f"b_ih_l{layer}{suffix}"]
                 + params[f"b_hh_l{layer}{suffix}"]).astype(jnp.float32)
            gates = jnp.dot(inp, w.T, preferred_element_type=jnp.float32) + b
            i = jax.nn.sigmoid(gates[:, 0 * H:1 * H])
            g = jnp.tanh(gates[:, 2 * H:3 * H])
            o = jax.nn.sigmoid(gates[:, 3 * H:4 * H])
            outs.append(o * jnp.tanh(i * g))
        inp = jnp.concatenate(outs, axis=-1).astype(jnp.bfloat16)
    fc_w = params["fc_w"].astype(jnp.bfloat16)
    return (jnp.dot(inp, fc_w.T, preferred_element_type=jnp.float32)
            + params["fc_b"].astype(jnp.float32))


# ----------------------------- main ------------------------------------------
if __name__ == "__main__":
    key = jax.random.PRNGKey(0)
    key, xk, pk = jax.random.split(key, 3)
    x = jax.random.normal(xk, (BATCH, INPUT_SIZE), jnp.float32)
    params = init_params(pk, INPUT_SIZE, HIDDEN_SIZE, NUM_LAYERS, NUM_CLASSES)

    packed = prepare_packed_params(params)           # one-time packing
    out = birnn_forward(packed, x)
    out = jax.block_until_ready(out)

    ref = birnn_reference(params, x)
    assert out.shape == (BATCH, NUM_CLASSES), out.shape
    assert jnp.allclose(out, ref, atol=1e-2, rtol=1e-2), \
        f"max abs diff {jnp.max(jnp.abs(out - ref))}"

    print("KERNEL_OK")
</pallas_src>

<mosaic_0001>
module attributes {stable_mosaic.version = 11 : i64} {
  func.func @_fused_birnn_kernel(%arg0: memref<8x64xbf16, #tpu.memory_space<vmem>>, %arg1: memref<64x256xbf16, #tpu.memory_space<vmem>>, %arg2: memref<1x256xf32, #tpu.memory_space<vmem>>, %arg3: memref<128x256xbf16, #tpu.memory_space<vmem>>, %arg4: memref<1x256xf32, #tpu.memory_space<vmem>>, %arg5: memref<128x128xbf16, #tpu.memory_space<vmem>>, %arg6: memref<1x128xf32, #tpu.memory_space<vmem>>, %arg7: memref<8x128xf32, #tpu.memory_space<vmem>>) attributes {dimension_semantics = [], scalar_prefetch = 0 : i64, scratch_operands = 0 : i64, tpu.core_type = #tpu.core_type<tc>} {
    %c0 = arith.constant 0 : index
    %c0_0 = arith.constant 0 : index
    %0 = vector.load %arg0[%c0, %c0_0] : memref<8x64xbf16, #tpu.memory_space<vmem>>, vector<8x64xbf16>
    %1 = tpu.iota {dimensions = array<i32: 1>} : vector<8x128xi32>
    %c0_1 = arith.constant 0 : index
    %c0_2 = arith.constant 0 : index
    %2 = vector.load %arg1[%c0_1, %c0_2] : memref<64x256xbf16, #tpu.memory_space<vmem>>, vector<64x256xbf16>
    %c0_3 = arith.constant 0 : index
    %c0_4 = arith.constant 0 : index
    %3 = vector.load %arg2[%c0_3, %c0_4] : memref<1x256xf32, #tpu.memory_space<vmem>>, vector<1x256xf32>
    %cst = arith.constant dense<0.000000e+00> : vector<8x256xf32>
    %4 = tpu.matmul %0, %2, %cst {dimension_numbers = #tpu.dot_dimension_numbers<[1], [0], [0], [1], [0, 0, 1, 1], [], []>} : vector<8x64xbf16>, vector<64x256xbf16>, vector<8x256xf32> -> vector<8x256xf32>
    %5 = vector.broadcast %3 : vector<1x256xf32> to vector<8x256xf32>
    %6 = arith.addf %4, %5 : vector<8x256xf32>
    %7 = vector.extract_strided_slice %6 {offsets = [0, 0], sizes = [8, 128], strides = [1, 1]} : vector<8x256xf32> to vector<8x128xf32>
    %8 = vector.extract_strided_slice %6 {offsets = [0, 128], sizes = [8, 128], strides = [1, 1]} : vector<8x256xf32> to vector<8x128xf32>
    %c64_i32 = arith.constant 64 : i32
    %9 = vector.broadcast %c64_i32 : i32 to vector<8x128xi32>
    %10 = arith.cmpi slt, %1, %9 : vector<8x128xi32>
    %11 = arith.negf %7 : vector<8x128xf32>
    %12 = math.exp %11 : vector<8x128xf32>
    %cst_5 = arith.constant 1.000000e+00 : f32
    %13 = vector.broadcast %cst_5 : f32 to vector<8x128xf32>
    %14 = arith.addf %13, %12 : vector<8x128xf32>
    %15 = arith.divf %13, %14 : vector<8x128xf32>
    %16 = math.tanh %7 : vector<8x128xf32>
    %17 = arith.select %10, %15, %16 : vector<8x128xi1>, vector<8x128xf32>
    %c64_i32_6 = arith.constant 64 : i32
    %18 = tpu.dynamic_rotate %17 by %c64_i32_6 dim 1 : vector<8x128xf32>, i32 -> vector<8x128xf32>
    %19 = arith.mulf %17, %18 : vector<8x128xf32>
    %20 = arith.negf %8 : vector<8x128xf32>
    %21 = math.exp %20 : vector<8x128xf32>
    %cst_7 = arith.constant 1.000000e+00 : f32
    %22 = vector.broadcast %cst_7 : f32 to vector<8x128xf32>
    %23 = arith.addf %22, %21 : vector<8x128xf32>
    %24 = arith.divf %22, %23 : vector<8x128xf32>
    %25 = math.tanh %19 : vector<8x128xf32>
    %26 = arith.mulf %24, %25 : vector<8x128xf32>
    %c64_i32_8 = arith.constant 64 : i32
    %27 = vector.broadcast %c64_i32_8 : i32 to vector<8x128xi32>
    %28 = arith.cmpi slt, %1, %27 : vector<8x128xi32>
    %cst_9 = arith.constant 0.000000e+00 : f32
    %29 = vector.broadcast %cst_9 : f32 to vector<8x128xf32>
    %30 = arith.select %28, %26, %29 : vector<8x128xi1>, vector<8x128xf32>
    %31 = arith.truncf %30 : vector<8x128xf32> to vector<8x128xbf16>
    %c0_10 = arith.constant 0 : index
    %c0_11 = arith.constant 0 : index
    %32 = vector.load %arg3[%c0_10, %c0_11] : memref<128x256xbf16, #tpu.memory_space<vmem>>, vector<128x256xbf16>
    %c0_12 = arith.constant 0 : index
    %c0_13 = arith.constant 0 : index
    %33 = vector.load %arg4[%c0_12, %c0_13] : memref<1x256xf32, #tpu.memory_space<vmem>>, vector<1x256xf32>
    %cst_14 = arith.constant dense<0.000000e+00> : vector<8x256xf32>
    %34 = tpu.matmul %31, %32, %cst_14 {dimension_numbers = #tpu.dot_dimension_numbers<[1], [0], [0], [1], [0, 0, 1, 1], [], []>} : vector<8x128xbf16>, vector<128x256xbf16>, vector<8x256xf32> -> vector<8x256xf32>
    %35 = vector.broadcast %33 : vector<1x256xf32> to vector<8x256xf32>
    %36 = arith.addf %34, %35 : vector<8x256xf32>
    %37 = vector.extract_strided_slice %36 {offsets = [0, 0], sizes = [8, 128], strides = [1, 1]} : vector<8x256xf32> to vector<8x128xf32>
    %38 = vector.extract_strided_slice %36 {offsets = [0, 128], sizes = [8, 128], strides = [1, 1]} : vector<8x256xf32> to vector<8x128xf32>
    %c64_i32_15 = arith.constant 64 : i32
    %39 = vector.broadcast %c64_i32_15 : i32 to vector<8x128xi32>
    %40 = arith.cmpi slt, %1, %39 : vector<8x128xi32>
    %41 = arith.negf %37 : vector<8x128xf32>
    %42 = math.exp %41 : vector<8x128xf32>
    %cst_16 = arith.constant 1.000000e+00 : f32
    %43 = vector.broadcast %cst_16 : f32 to vector<8x128xf32>
    %44 = arith.addf %43, %42 : vector<8x128xf32>
    %45 = arith.divf %43, %44 : vector<8x128xf32>
    %46 = math.tanh %37 : vector<8x128xf32>
    %47 = arith.select %40, %45, %46 : vector<8x128xi1>, vector<8x128xf32>
    %c64_i32_17 = arith.constant 64 : i32
    %48 = tpu.dynamic_rotate %47 by %c64_i32_17 dim 1 : vector<8x128xf32>, i32 -> vector<8x128xf32>
    %49 = arith.mulf %47, %48 : vector<8x128xf32>
    %50 = arith.negf %38 : vector<8x128xf32>
    %51 = math.exp %50 : vector<8x128xf32>
    %cst_18 = arith.constant 1.000000e+00 : f32
    %52 = vector.broadcast %cst_18 : f32 to vector<8x128xf32>
    %53 = arith.addf %52, %51 : vector<8x128xf32>
    %54 = arith.divf %52, %53 : vector<8x128xf32>
    %55 = math.tanh %49 : vector<8x128xf32>
    %56 = arith.mulf %54, %55 : vector<8x128xf32>
    %c64_i32_19 = arith.constant 64 : i32
    %57 = vector.broadcast %c64_i32_19 : i32 to vector<8x128xi32>
    %58 = arith.cmpi slt, %1, %57 : vector<8x128xi32>
    %cst_20 = arith.constant 0.000000e+00 : f32
    %59 = vector.broadcast %cst_20 : f32 to vector<8x128xf32>
    %60 = arith.select %58, %56, %59 : vector<8x128xi1>, vector<8x128xf32>
    %61 = arith.truncf %60 : vector<8x128xf32> to vector<8x128xbf16>
    %c0_21 = arith.constant 0 : index
    %c0_22 = arith.constant 0 : index
    %62 = vector.load %arg5[%c0_21, %c0_22] : memref<128x128xbf16, #tpu.memory_space<vmem>>, vector<128x128xbf16>
    %cst_23 = arith.constant dense<0.000000e+00> : vector<8x128xf32>
    %63 = tpu.matmul %61, %62, %cst_23 {dimension_numbers = #tpu.dot_dimension_numbers<[1], [0], [0], [1], [0, 0, 1, 1], [], []>} : vector<8x128xbf16>, vector<128x128xbf16>, vector<8x128xf32> -> vector<8x128xf32>
    %c0_24 = arith.constant 0 : index
    %c0_25 = arith.constant 0 : index
    %64 = vector.load %arg6[%c0_24, %c0_25] : memref<1x128xf32, #tpu.memory_space<vmem>>, vector<1x128xf32>
    %65 = vector.broadcast %64 : vector<1x128xf32> to vector<8x128xf32>
    %66 = arith.addf %63, %65 : vector<8x128xf32>
    %c0_26 = arith.constant 0 : index
    %c0_27 = arith.constant 0 : index
    %67 = vector.load %arg7[%c0_26, %c0_27] : memref<8x128xf32, #tpu.memory_space<vmem>>, vector<8x128xf32>
    tpu.vector_store %arg7[%c0_26, %c0_27], %66 {strides = array<i32>} : memref<8x128xf32, #tpu.memory_space<vmem>>, vector<8x128xf32>,
    return
  }
}

</mosaic_0001>

<bundles_post_ra>
// kernel: birnn_forward.1
= control target key start
LH: loop header
LB: loop body
LE: loop exit
PB: predicated region body
PF: predicated region fallthrough
CT: control target
= control target key end

     0   :  { %12 = vsyncpa [#allocation3], 0  ;;  %s845_s0 = inlined_call_operand.vmem [shape: bf16[8,64], index: 0, kind: input, shape index: {}]   ;;  %s846_s1 = inlined_call_operand.hbm [shape: bf16[64,256], index: 1, kind: input, shape index: {}]   ;;  %s847_s2 = inlined_call_operand.vmem [shape: f32[1,256], index: 2, kind: input, shape index: {}]   ;;  %s848_s3 = inlined_call_operand.hbm [shape: bf16[128,256], index: 3, kind: input, shape index: {}]   ;;  %s849_s4 = inlined_call_operand.vmem [shape: f32[1,256], index: 4, kind: input, shape index: {}]   ;;  %s850_s5 = inlined_call_operand.hbm [shape: bf16[128,128], index: 5, kind: input, shape index: {}]   ;;  %s851_s6 = inlined_call_operand.vmem [shape: f32[1,128], index: 6, kind: input, shape index: {}]   ;;  %s852_s7 = inlined_call_operand.vmem [shape: f32[8,128], index: 7, kind: output, shape index: {}]  }
   0x1   :  { %13 = vsyncpa [#allocation5], 0  ;;  %s707_s24 = smov [#allocation4]   ;;  %s708_s26 = smov [#allocation2]  }
   0x2   :  { %s35_s25 = sshll.u32 %s707_s24, 4  ;;  %s21_s27 = sshll.u32 %s708_s26, 4  ;;  %s36_s25 = int_to_ptr.vmem [resolvable:$true] %s35_s25  ;;  %s757_s27 = int_to_ptr.vmem [resolvable:$true] %s21_s27 }
   0x3   :  { %s637_s30 = scalar_lea.hbm %s848_s3, 2048 }
   0x4   :  { %p638_p0 = scmp.ne.s32.totalorder %s848_s3, %s637_s30  ;;  %p641_p1 = scmp.lt.u32.totalorder %s637_s30, %s848_s3 }
   0x6   :  { %p643_p2 = pnand %p641_p1, %p638_p0 }
   0x8   :  { %646 = shalt.err (!%p643_p2)
}
   0x9   :  { %s647_s12 = scalar_lea.vmem %s36_s25, 2048  ;;  %p652_p4 = scmp.lt.s32.totalorder %s36_s25, %s36_s25 }
   0xa   :  { %p648_p3 = scmp.ne.s32.totalorder %s36_s25, %s647_s12  ;;  %p653_p5 = scmp.lt.s32.totalorder %s647_s12, %s647_s12 }
   0xc   :  { %p654_p6 = por %p653_p5, %p652_p4 }
   0xe   :  { %p655_p7 = pnand %p654_p6, %p648_p3 }
  0x10   :  { %658 = shalt.err (!%p655_p7)
}
  0x11   :  { %s709_s13 = smov 128   ;;  %s710_s14 = smov 8  }
  0x12   :  { %41 = dma.hbm_to_vmem [thread:$0]  %s848_s3, 2048, %s36_s25, [#allocation5], %s709_s13, %s709_s13, %s710_s14  }
  0x13   :  { %s659_s19 = scalar_lea.hbm %s846_s1, 1024 }
  0x14   :  { %p660_p8 = scmp.ne.s32.totalorder %s846_s1, %s659_s19  ;;  %p663_p9 = scmp.lt.u32.totalorder %s659_s19, %s846_s1 }
  0x16   :  { %p665_p10 = pnand %p663_p9, %p660_p8 }
  0x18   :  { %668 = shalt.err (!%p665_p10)
}
  0x19   :  { %s669_s24 = scalar_lea.vmem %s757_s27, 1024  ;;  %p674_p12 = scmp.lt.s32.totalorder %s757_s27, %s757_s27 }
  0x1a   :  { %p670_p11 = scmp.ne.s32.totalorder %s757_s27, %s669_s24  ;;  %p675_p13 = scmp.lt.s32.totalorder %s669_s24, %s669_s24 }
  0x1c   :  { %p676_p0 = por %p675_p13, %p674_p12 }
  0x1e   :  { %p677_p1 = pnand %p676_p0, %p670_p11 }
  0x20   :  { %680 = shalt.err (!%p677_p1)
}
  0x21   :  { %27 = dma.hbm_to_vmem [thread:$0]  %s846_s1, 1024, %s757_s27, [#allocation3], %s709_s13, %s709_s13, %s710_s14  }
  0x22   :  { %s711_s26 = smov [#allocation6]   ;;  %s681_s8 = scalar_lea.hbm %s850_s5, 1024 }
  0x23   :  { %s49_s28 = sshll.u32 %s711_s26, 4  ;;  %p682_p2 = scmp.ne.s32.totalorder %s850_s5, %s681_s8  ;;  %s50_s28 = int_to_ptr.vmem [resolvable:$true] %s49_s28 }
  0x24   :  { %p685_p3 = scmp.lt.u32.totalorder %s681_s8, %s850_s5 }
  0x26   :  { %p687_p4 = pnand %p685_p3, %p682_p2 }
  0x28   :  { %690 = shalt.err (!%p687_p4)
}
  0x29   :  { %s691_s15 = scalar_lea.vmem %s50_s28, 1024  ;;  %p696_p6 = scmp.lt.s32.totalorder %s50_s28, %s50_s28 }
  0x2a   :  { %p692_p5 = scmp.ne.s32.totalorder %s50_s28, %s691_s15  ;;  %p697_p7 = scmp.lt.s32.totalorder %s691_s15, %s691_s15 }
  0x2c   :  { %p698_p8 = por %p697_p7, %p696_p6 }
  0x2e   :  { %p699_p9 = pnand %p698_p8, %p692_p5 }
  0x30   :  { %702 = shalt.err (!%p699_p9)
}
  0x31   :  { %s712_s1 = smov 64   ;;  %s713_s27 = smov 4  }
  0x32   :  { %55 = dma.hbm_to_vmem [thread:$0]  %s850_s5, 1024, %s50_s28, [#allocation5], %s712_s1, %s712_s1, %s713_s27  }
  0x33   :  { %703 = dma.done.wait [#allocation3], 1024  }
  0x34   :  { %704 = vsyncadd [#allocation3], 4294966272 }
  0x35   :  { %705 = dma.done.wait [#allocation5], 3072  }
  0x36   :  { %706 = vsyncadd [#allocation5], 4294964224  ;;  %v714_v0 = vmov 0   ;;  %v569_v1 = vld [vmem:[#allocation2 + $0x4] ss:$8 sps:$4 sm:$0xff]   ;;  %vm131_vm0 = vcmask 523264   ;;  %v69_v18 = vlaneseq }
  0x37   :  { %167 = vmatprep.mubr.bf16.mxu0 %v714_v0  ;;  %338 = vmatprep.mubr.bf16.mxu1 %v714_v0  ;;  %v571_v2 = vld [vmem:[#allocation2] ss:$8 sps:$4 sm:$0xff]   ;;  %v572_v3 = vld [vmem:[#allocation2 + $0x14] ss:$8 sps:$4 sm:$0xff]   ;;  %v574_v4 = vld [vmem:[#allocation2 + $0x10] ss:$8 sps:$4 sm:$0xff]  }
  0x38   :  { %135 = vmatprep.subr.bf16.mxu0 %v569_v1  ;;  %v575_v5 = vld [vmem:[#allocation2 + $0x24] ss:$8 sps:$4 sm:$0xff]   ;;  %v577_v6 = vld [vmem:[#allocation2 + $0x20] ss:$8 sps:$4 sm:$0xff]   ;;  %v578_v7 = vld [vmem:[#allocation2 + $0x34] ss:$8 sps:$4 sm:$0xff]  }
  0x39   :  { %136 = vmatpush1.bf16.msra.mxu0 %v571_v2  ;;  %v580_v8 = vld [vmem:[#allocation2 + $0x30] ss:$8 sps:$4 sm:$0xff]   ;;  %v68_v9 = vld [vmem:[%s845_s0] sm:$0xf]  ;;  %v581_v10 = vld [vmem:[#allocation4 + $0x4] ss:$8 sps:$4 sm:$0xff]  }
  0x3a   :  { %137 = vmatprep.subr.bf16.mxu0 %v572_v3  ;;  %v583_v11 = vld [vmem:[#allocation4] ss:$8 sps:$4 sm:$0xff]   ;;  %v584_v12 = vld [vmem:[#allocation4 + $0x14] ss:$8 sps:$4 sm:$0xff]   ;;  %306 = vmatprep.subr.bf16.mxu1 %v581_v10  ;;  %v586_v13 = vld [vmem:[#allocation4 + $0x10] ss:$8 sps:$4 sm:$0xff]  }
  0x3b   :  { %307 = vmatpush1.bf16.msra.mxu1 %v583_v11  ;;  %v587_v14 = vld [vmem:[#allocation4 + $0x24] ss:$8 sps:$4 sm:$0xff]   ;;  %v589_v15 = vld [vmem:[#allocation4 + $0x20] ss:$8 sps:$4 sm:$0xff]   ;;  %v590_v16 = vld [vmem:[#allocation4 + $0x34] ss:$8 sps:$4 sm:$0xff]  }
  0x3c   :  { %308 = vmatprep.subr.bf16.mxu1 %v584_v12  ;;  %v592_v17 = vld [vmem:[#allocation4 + $0x30] ss:$8 sps:$4 sm:$0xff]   ;;  %v805_v19 = vshrl.u32 %v69_v18, 7  ;;  %v79_v21 = vld [vmem:[%s847_s2] sm:$0x3]  ;;  %v813_v36 = vand.u32 127, %v69_v18 }
  0x3d   :  { %138 = vmatpush1.bf16.msra.mxu0 %v574_v4  ;;  %v593_v31 = vld [vmem:[#allocation4 + $0x44] ss:$8 sps:$4 sm:$0xff]   ;;  %v595_v32 = vld [vmem:[#allocation4 + $0x40] ss:$8 sps:$4 sm:$0xff]   ;;  %v596_v33 = vld [vmem:[#allocation4 + $0x54] ss:$8 sps:$4 sm:$0xff]  }
  0x3e   :  { %139 = vmatprep.subr.bf16.mxu0 %v575_v5  ;;  %v83_v20 = vsub.s32 0, %v805_v19  ;;  %v598_v34 = vld [vmem:[#allocation4 + $0x50] ss:$8 sps:$4 sm:$0xff]   ;;  %v599_v35 = vld [vmem:[#allocation4 + $0x64] ss:$8 sps:$4 sm:$0xff]   ;;  %vm176_vm1 = vcmp.lt.s32.totalorder %v813_v36, 64 }
  0x3f   :  { %309 = vmatpush1.bf16.msra.mxu1 %v586_v13  ;;  %v601_v37 = vld [vmem:[#allocation4 + $0x60] ss:$8 sps:$4 sm:$0xff]   ;;  %v602_v38 = vld [vmem:[#allocation4 + $0x74] ss:$8 sps:$4 sm:$0xff]   ;;  %v604_v40 = vld [vmem:[#allocation4 + $0x70] ss:$8 sps:$4 sm:$0xff]  }
  0x40   :  { %310 = vmatprep.subr.bf16.mxu1 %v587_v14  ;;  %v84_v22 = vrot.slane %v79_v21, %v83_v20  ;;  %v87_v43 = vsub.s32 1, %v805_v19  ;;  %vm823_vm2 = vmpackc.low %vm176_vm1, %vm176_vm1  ;;  %v605_v56 = vld [vmem:[#allocation6] sm:$0xff]   ;;  %v715_v57 = vmov 0.0   ;;  %v606_v58 = vld [vmem:[#allocation6 + $0x8] sm:$0xff]   ;;  %vm716_vm3 = vmmov 0  }
  0x41   :  { %140 = vmatpush1.bf16.msra.mxu0 %v577_v6  ;;  %v607_v59 = vld [vmem:[#allocation6 + $0x10] sm:$0xff]   ;;  %v608_v60 = vld [vmem:[#allocation6 + $0x18] sm:$0xff]   ;;  %v214_v61 = vld [vmem:[%s849_s4] sm:$0x3] }
  0x42   :  { %141 = vmatprep.subr.bf16.mxu0 %v578_v7  ;;  %v88_v44 = vrot.slane %v79_v21, %v87_v43  ;;  %v219_v62 = vrot.slane %v214_v61, %v83_v20  ;;  %v609_v7 = vld [vmem:[#allocation6 + $0x20] sm:$0xff]   ;;  %v612_v13 = vld [vmem:[#allocation6 + $0x38] sm:$0xff]   ;;  %v223_v14 = vrot.slane %v214_v61, %v87_v43 }
  0x43   :  { %311 = vmatpush1.bf16.msra.mxu1 %v589_v15 }
  0x44   :  { %312 = vmatprep.subr.bf16.mxu1 %v590_v16 }
  0x45   :  { %142 = vmatpush1.bf16.msra.mxu0 %v580_v8  ;;  %v610_v8 = vld [vmem:[#allocation6 + $0x28] sm:$0xff]  }
  0x46   :  { %539 = vmatprep.subr.bf16.mxu0 %v715_v57 }
  0x47   :  { %313 = vmatpush1.bf16.msra.mxu1 %v592_v17 }
  0x48   :  { %494 = vmatmul.mubr.msk.bf16.vlgmr.msra.gmra.mrb[0].mxu0 %vm131_vm0, %v68_v9  ;;  %314 = vmatprep.subr.bf16.mxu1 %v593_v31  ;;  %v611_v9 = vld [vmem:[#allocation6 + $0x30] sm:$0xff]  }
  0x49   :  { %540 = vmatpush3.bf16.msra.mxu0 %v605_v56  ;;  %555 = vmatprep.mubr.msk.bf16.mxu0 %vm716_vm3, %v715_v57 }
  0x4a   :  { %541 = vmatprep.subr.bf16.mxu0 %v715_v57 }
  0x4b   :  { %315 = vmatpush1.bf16.msra.mxu1 %v595_v32 }
  0x4c   :  { %316 = vmatprep.subr.bf16.mxu1 %v596_v33 }
  0x4d   :  { %542 = vmatpush3.bf16.msra.mxu0 %v606_v58 }
  0x4e   :  { %543 = vmatprep.subr.bf16.mxu0 %v715_v57 }
  0x4f   :  { %317 = vmatpush1.bf16.msra.mxu1 %v598_v34 }
  0x50   :  { %318 = vmatprep.subr.bf16.mxu1 %v599_v35 }
  0x51   :  { %544 = vmatpush3.bf16.msra.mxu0 %v607_v59 }
  0x52   :  { %545 = vmatprep.subr.bf16.mxu0 %v715_v57 }
  0x53   :  { %319 = vmatpush1.bf16.msra.mxu1 %v601_v37 }
  0x54   :  { %320 = vmatprep.subr.bf16.mxu1 %v602_v38 }
  0x55   :  { %546 = vmatpush3.bf16.msra.mxu0 %v608_v60 }
  0x56   :  { %547 = vmatprep.subr.bf16.mxu0 %v715_v57 }
  0x57   :  { %321 = vmatpush1.bf16.msra.mxu1 %v604_v40 }
  0x59   :  { %548 = vmatpush3.bf16.msra.mxu0 %v609_v7 }
  0x5a   :  { %549 = vmatprep.subr.bf16.mxu0 %v715_v57 }
  0x5d   :  { %550 = vmatpush3.bf16.msra.mxu0 %v610_v8 }
  0x5e   :  { %551 = vmatprep.subr.bf16.mxu0 %v715_v57 }
  0x61   :  { %552 = vmatpush3.bf16.msra.mxu0 %v611_v9 }
  0x62   :  { %553 = vmatprep.subr.bf16.mxu0 %v715_v57 }
  0x65   :  { %554 = vmatpush3.bf16.msra.mxu0 %v612_v13 }
 0x11b   :  { %v169_v23 = vpop.f32.mrb[0].mxu0 }
 0x11c   :  { %v170_v24 = vadd.f32 %v169_v23, %v84_v22  ;;  %v171_v25 = vpop.f32.mrb[1].mxu0 }
 0x11d   :  { %v173_v26 = vpop.f32.mrb[2].mxu0  ;;  %v172_v45 = vadd.f32 %v171_v25, %v88_v44  ;;  %v518_v25 = vld [vmem:[%s851_s6] ss:$0 sm:$0xff] }
 0x11e   :  { %v495_v27 = vmul.f32 -1.442695, %v170_v24  ;;  %v174_v28 = vpop.f32.mrb[3].mxu0 }
 0x11f   :  { %v496_v46 = vmul.f32 -1.442695, %v172_v45 }
 0x120   :  { %613 = vpow2.f32 %v495_v27 }
 0x121   :  { %615 = vtanh.f32 %v170_v24 }
 0x12a   :  { %v614_v29 = vpop.eup %613 }
 0x12b   :  { %v180_v30 = vadd.f32 1.0, %v614_v29  ;;  %v616_v39 = vpop.eup %615 }
 0x12d   :  { %617 = vrcp.f32 %v180_v30 }
 0x12e   :  { %619 = vpow2.f32 %v496_v46 }
 0x137   :  { %v618_v41 = vpop.eup %617 }
 0x138   :  { %v184_v42 = vsel %vm176_vm1, %v618_v41, %v616_v39  ;;  %v620_v47 = vpop.eup %619 }
 0x139   :  { %185 = vrot.lane.b32.xlu0 %v184_v42, %s712_s1  ;;  %v191_v48 = vadd.f32 1.0, %v620_v47 }
 0x13b   :  { %621 = vrcp.f32 %v191_v48 }
 0x145   :  { %v622_v51 = vpop.eup %621 }
 0x1ab   :  { %v186_v49 = vpop.permute.xlu0 %185 }
 0x1ac   :  { %v187_v50 = vmul.f32 %v186_v49, %v184_v42 }
 0x1ae   :  { %623 = vtanh.f32 %v187_v50 }
 0x1b8   :  { %v624_v52 = vpop.eup %623 }
 0x1b9   :  { %v195_v53 = vmul.f32 %v624_v52, %v622_v51 }
 0x1bb   :  { %v514_v55 = vpack.c.bf16 %v195_v53, %v195_v53 }
 0x1bd   :  { %515 = vmatmul.mubr.msk.bf16.vlgmr.msra.gmra.mrb[0].mxu1 %vm823_vm2, %v514_v55 }
 0x290   :  { %v340_v63 = vpop.f32.mrb[0].mxu1 }
 0x291   :  { %v341_v0 = vadd.f32 %v340_v63, %v219_v62  ;;  %v342_v1 = vpop.f32.mrb[1].mxu1 }
 0x292   :  { %v344_v2 = vpop.f32.mrb[2].mxu1  ;;  %v343_v15 = vadd.f32 %v342_v1, %v223_v14 }
 0x293   :  { %v516_v3 = vmul.f32 -1.442695, %v341_v0  ;;  %v345_v4 = vpop.f32.mrb[3].mxu1 }
 0x294   :  { %v517_v16 = vmul.f32 -1.442695, %v343_v15 }
 0x295   :  { %625 = vpow2.f32 %v516_v3 }
 0x296   :  { %627 = vtanh.f32 %v341_v0 }
 0x29f   :  { %v626_v5 = vpop.eup %625 }
 0x2a0   :  { %v350_v6 = vadd.f32 1.0, %v626_v5  ;;  %v628_v10 = vpop.eup %627 }
 0x2a2   :  { %629 = vrcp.f32 %v350_v6 }
 0x2a3   :  { %631 = vpow2.f32 %v517_v16 }
 0x2ac   :  { %v630_v11 = vpop.eup %629 }
 0x2ad   :  { %v354_v12 = vsel %vm176_vm1, %v630_v11, %v628_v10  ;;  %v632_v17 = vpop.eup %631 }
 0x2ae   :  { %355 = vrot.lane.b32.xlu0 %v354_v12, %s712_s1  ;;  %v361_v18 = vadd.f32 1.0, %v632_v17 }
 0x2b0   :  { %633 = vrcp.f32 %v361_v18 }
 0x2ba   :  { %v634_v21 = vpop.eup %633 }
 0x320   :  { %v356_v19 = vpop.permute.xlu0 %355 }
 0x321   :  { %v357_v20 = vmul.f32 %v356_v19, %v354_v12 }
 0x323   :  { %635 = vtanh.f32 %v357_v20 }
 0x32d   :  { %v636_v22 = vpop.eup %635 }
 0x32e   :  { %v365_v23 = vmul.f32 %v636_v22, %v634_v21 }
 0x330   :  { %v528_v24 = vpack.c.bf16 %v365_v23, %v365_v23 }
 0x332   :  { %556 = vmatmul.mubr.msk.bf16.vlgmr.msra.gmra.mrb[4].mxu0 %vm823_vm2, %v528_v24 }
 0x405   :  { %v473_v26 = vpop.f32.mrb[4].mxu0 }
 0x406   :  { %v474_v27 = vadd.f32 %v518_v25, %v473_v26  ;;  %v557_v28 = vpop.f32.mrb[5].mxu0 }
 0x407   :  { %v476_v29 = vpop.f32.mrb[6].mxu0 }
 0x408   :  { %479 = vst [vmem:[%s852_s7] sm:$0xff] %v474_v27  ;;  %v558_v30 = vpop.f32.mrb[7].mxu0 }
 0x409   :  { %484 = vsyncpa [#allocation3], 1 }
 0x40a   :  { %485 = vsyncpa [#allocation5], 1 }

</bundles_post_ra>
